<compile_context>
chip_gen: v7x
topology: tpu7x:2x2x1
jax: 0.10.0
libtpu: 0.0.40
codegen_flags: <defaults>
</compile_context>

<pallas_src>
import functools

import jax
import jax.numpy as jnp
from jax.experimental import pallas as pl
from jax.experimental.pallas import tpu as pltpu


def _round_up(n, m):
    return ((n + m - 1) // m) * m


def _pad_dim(d):
    """Pad a feature dim to 128; keep large dims 256-aligned (MXU occupancy,
    and guarantees a good tile divisor for the layered path)."""
    p = _round_up(d, 128)
    if p > 512 and p % 256 != 0:
        p = _round_up(d, 256)
    return p


def _pick_tile(total, cap):
    """Largest multiple of 128 that divides `total` (a multiple of 128), <= cap."""
    best = 128
    t = 128
    while t <= min(total, cap):
        if total % t == 0:
            best = t
        t += 128
    return best


def _tpu_vmem_budgets():
    """Return (fused working-set budget, scoped vmem limit) per TPU generation."""
    try:
        vmem = int(pltpu.get_tpu_info().vmem_capacity_bytes)
    except Exception:
        vmem = 64 * 1024 * 1024          # conservative if query unavailable
    if vmem >= 100 * 1024 * 1024:        # v5e / v6e: 128 MiB physical VMEM
        return 80 * 1024 * 1024, 100 * 1024 * 1024
    return 36 * 1024 * 1024, 52 * 1024 * 1024   # v7x: 64 MiB physical VMEM


# ----------------------------------------------------------------------------
# Fused kernel: the whole FFN for one batch tile.  All weights fully resident
# in VMEM; intermediate activations never touch HBM.
# ----------------------------------------------------------------------------
def _fused_ffn_kernel(x_ref, *refs, relu_flags, compute_dtype):
    o_ref = refs[-1]
    wb_refs = refs[:-1]
    n_layers = len(wb_refs) // 2

    h = x_ref[...]
    y = h
    for l in range(n_layers):
        w = wb_refs[2 * l][...]
        b = wb_refs[2 * l + 1][...]                       # (1, d2p), float32
        y = jnp.dot(h, w, preferred_element_type=jnp.float32)
        y = y + b.astype(jnp.float32)
        if relu_flags[l]:
            y = jnp.maximum(y, 0.0)
        if l != n_layers - 1:
            h = y.astype(compute_dtype)
    o_ref[...] = y.astype(o_ref.dtype)


# ----------------------------------------------------------------------------
# Fallback kernel: one fused  y = relu?(x @ W + b)  layer, K-axis accumulation,
# accumulator initialised with the broadcast bias at k == 0.
# ----------------------------------------------------------------------------
def _linear_kernel(x_ref, w_ref, b_ref, o_ref, acc_ref, *, apply_relu):
    @pl.when(pl.program_id(2) == 0)
    def _():
        acc_ref[...] = jnp.broadcast_to(b_ref[...], acc_ref.shape).astype(jnp.float32)

    acc_ref[...] += jnp.dot(x_ref[...], w_ref[...],
                            preferred_element_type=jnp.float32)

    @pl.when(pl.program_id(2) == pl.num_programs(2) - 1)
    def _():
        y = acc_ref[...]
        if apply_relu:
            y = jnp.maximum(y, 0.0)
        o_ref[...] = y.astype(o_ref.dtype)


def pallas_linear_padded(x, w, b, *, apply_relu, out_dtype, tm, vmem_limit):
    """y = relu?(x @ w + b) on pre-padded operands.

    x: [M, K] with M % tm == 0, K % 128 == 0
    w: [K, N] with N % 128 == 0,  b: [1, N] float32
    """
    M, K = x.shape
    K2, N = w.shape
    assert K == K2 and M % tm == 0 and K % 128 == 0 and N % 128 == 0

    tn = _pick_tile(N, 1024)
    tk = _pick_tile(K, 1024)
    grid = (M // tm, N // tn, K // tk)

    isz = jnp.dtype(x.dtype).itemsize
    cost = pl.CostEstimate(
        flops=2 * M * N * K,
        transcendentals=0,
        bytes_accessed=(M * K * isz + (M // tm) * K * N * isz
                        + M * N * jnp.dtype(out_dtype).itemsize + N * 4))

    return pl.pallas_call(
        functools.partial(_linear_kernel, apply_relu=apply_relu),
        out_shape=jax.ShapeDtypeStruct((M, N), out_dtype),
        grid_spec=pltpu.PrefetchScalarGridSpec(
            num_scalar_prefetch=0,
            grid=grid,
            in_specs=[
                pl.BlockSpec((tm, tk), lambda i, j, k: (i, k)),
                pl.BlockSpec((tk, tn), lambda i, j, k: (k, j)),
                pl.BlockSpec((1, tn), lambda i, j, k: (0, j)),
            ],
            out_specs=pl.BlockSpec((tm, tn), lambda i, j, k: (i, j)),
            scratch_shapes=[pltpu.VMEM((tm, tn), jnp.float32)],
        ),
        compiler_params=pltpu.CompilerParams(
            dimension_semantics=("parallel", "parallel", "arbitrary"),
            vmem_limit_bytes=vmem_limit,
        ),
        cost_estimate=cost,
    )(x, w, b)


# ----------------------------------------------------------------------------
# FeedForward module (Pallas-backed forward pass).
# ----------------------------------------------------------------------------
class FeedForwardPallas:
    _TM_CAP = 512                        # batch-tile cap (rows per grid step)

    def __init__(self, in_dim, out_dim, hidden_dim, depth=None, act_last=True,
                 bias=True, dropout=0.0, compute_dtype=jnp.bfloat16, key=None):
        if isinstance(hidden_dim, int):
            assert depth is not None
            hidden_dim = [hidden_dim] * depth
        else:
            hidden_dim = list(hidden_dim)
            depth = len(hidden_dim)

        assert bias, "bias=False not implemented in the Pallas port"
        # TODO(synk): dropout is a no-op here (p=0 default / eval mode);
        # stochastic dropout would need pltpu.prng_* inside the kernel.

        self.depth = depth
        self.act_last = act_last
        self.in_dim = in_dim
        self.out_dim = out_dim
        self.compute_dtype = compute_dtype
        self.out_dtype = jnp.float32

        self._fused_budget, self._vmem_limit = _tpu_vmem_budgets()
        self._fused_single_buffer = None   # decided by one-time runtime probe

        if key is None:
            key = jax.random.PRNGKey(0)

        dims = [in_dim]
        for l in range(depth):
            dims.append(hidden_dim[l] if l != depth - 1 else out_dim)
        self.dims = dims
        self.padded_dims = [_pad_dim(d) for d in dims]

        self.weights, self.biases = [], []   # logical params (reference)
        self.w_pad, self.b_pad = [], []      # padded once, kernel-ready
        for l in range(depth):
            d1, d2 = dims[l], dims[l + 1]
            d1p, d2p = self.padded_dims[l], self.padded_dims[l + 1]
            key, kw, kb = jax.random.split(key, 3)
            # deterministic init mimicking PyTorch's uniform(-1/sqrt(d1), 1/sqrt(d1))
            bound = 1.0 / (d1 ** 0.5)
            w = jax.random.uniform(kw, (d1, d2), jnp.float32, -bound, bound)
            bvec = jax.random.uniform(kb, (d2,), jnp.float32, -bound, bound)
            self.weights.append(w)
            self.biases.append(bvec)
            self.w_pad.append(
                jnp.pad(w, ((0, d1p - d1), (0, d2p - d2))).astype(compute_dtype))
            self.b_pad.append(
                jnp.pad(bvec, (0, d2p - d2)).reshape(1, d2p).astype(jnp.float32))

        self.relu_flags = tuple((l != depth - 1) or act_last for l in range(depth))

        # Fused single-kernel path if weights (single-buffered) plus the
        # activation working set fit the generation-aware VMEM budget.  The
        # runtime probe in _forward falls back gracefully if this estimate is
        # too optimistic for the actual compiler scratch usage.
        itemsize = jnp.dtype(compute_dtype).itemsize
        w_bytes = sum(w.size * itemsize for w in self.w_pad)
        b_bytes = sum(bp.size * 4 for bp in self.b_pad)
        io_bytes = 2 * self._TM_CAP * (self.padded_dims[0] * itemsize
                                       + self.padded_dims[-1] * 4)
        inter_bytes = self._TM_CAP * sum(self.padded_dims) * 4
        self._use_fused = (w_bytes + 2 * b_bytes + io_bytes + inter_bytes
                           <= self._fused_budget)

    # -- helpers -------------------------------------------------------------
    def _pad_batch_and_features(self, x2):
        M, K = x2.shape
        Kp = self.padded_dims[0]
        if M <= 8:
            tm = 8
        else:
            # >= 2 grid steps so both v7x TensorCores get work; free on v5e/v6e.
            tm = min(self._TM_CAP, _round_up((M + 1) // 2, 8))
        Mp = _round_up(M, tm)
        if (Mp, Kp) != (M, K):
            x2 = jnp.pad(x2, ((0, Mp - M), (0, Kp - K)))
        return x2, M, Mp, tm

    def _slice_out(self, out, M):
        Mp, Np = out.shape
        if Mp != M or Np != self.out_dim:
            out = out[:M, :self.out_dim]
        return out

    # -- fused single-kernel path ---------------------------------------------
    def _fused_call(self, xp, Mp, tm, single_buffer_weights):
        Kp = self.padded_dims[0]
        Np = self.padded_dims[-1]

        kernel = functools.partial(_fused_ffn_kernel,
                                   relu_flags=self.relu_flags,
                                   compute_dtype=self.compute_dtype)

        in_specs = [pl.BlockSpec((tm, Kp), lambda i: (i, 0))]
        args = [xp]
        for l in range(self.depth):
            d1p, d2p = self.padded_dims[l], self.padded_dims[l + 1]
            if single_buffer_weights:
                # Constant index_map -> weights stay resident; one buffer is enough.
                w_spec = pl.BlockSpec((d1p, d2p), lambda i: (0, 0),
                                      pipeline_mode=pl.Buffered(1))
                b_spec = pl.BlockSpec((1, d2p), lambda i: (0, 0),
                                      pipeline_mode=pl.Buffered(1))
            else:
                w_spec = pl.BlockSpec((d1p, d2p), lambda i: (0, 0))
                b_spec = pl.BlockSpec((1, d2p), lambda i: (0, 0))
            in_specs.append(w_spec)
            in_specs.append(b_spec)
            args.append(self.w_pad[l])
            args.append(self.b_pad[l])

        isz = jnp.dtype(self.compute_dtype).itemsize
        flops = 2 * Mp * sum(self.padded_dims[l] * self.padded_dims[l + 1]
                             for l in range(self.depth))
        bytes_accessed = (Mp * Kp * isz + Mp * Np * 4
                          + sum(w.size * isz for w in self.w_pad)
                          + sum(bp.size * 4 for bp in self.b_pad))

        return pl.pallas_call(
            kernel,
            out_shape=jax.ShapeDtypeStruct((Mp, Np), self.out_dtype),
            grid_spec=pltpu.PrefetchScalarGridSpec(
                num_scalar_prefetch=0,
                grid=(Mp // tm,),
                in_specs=in_specs,
                out_specs=pl.BlockSpec((tm, Np), lambda i: (i, 0)),
            ),
            compiler_params=pltpu.CompilerParams(
                dimension_semantics=("parallel",),
                vmem_limit_bytes=self._vmem_limit,
            ),
            cost_estimate=pl.CostEstimate(flops=flops, transcendentals=0,
                                          bytes_accessed=bytes_accessed),
        )(*args)

    # -- per-layer fallback path ----------------------------------------------
    def _forward_layered(self, x2):
        xp, M, Mp, tm = self._pad_batch_and_features(x2)
        h = xp
        for l in range(self.depth):
            last = l == self.depth - 1
            h = pallas_linear_padded(
                h, self.w_pad[l], self.b_pad[l],
                apply_relu=self.relu_flags[l],
                out_dtype=self.out_dtype if last else self.compute_dtype,
                tm=tm,
                vmem_limit=self._vmem_limit)
        return self._slice_out(h, M)

    # -- dispatch --------------------------------------------------------------
    def _forward(self, x2):
        if self._use_fused:
            xp, M, Mp, tm = self._pad_batch_and_features(x2)
            if self._fused_single_buffer is None:
                # One-time probe: prefer single-buffered resident weights,
                # fall back to default double-buffering, then to the layered path.
                for sb in (True, False):
                    try:
                        out = self._fused_call(xp, Mp, tm, sb)
                        jax.block_until_ready(out)
                        self._fused_single_buffer = sb
                        return self._slice_out(out, M)
                    except Exception:
                        continue
                self._use_fused = False
            else:
                out = self._fused_call(xp, Mp, tm, self._fused_single_buffer)
                return self._slice_out(out, M)
        return self._forward_layered(x2)

    def __call__(self, x):
        lead = x.shape[:-1]
        x2 = x.reshape(-1, x.shape[-1]).astype(self.compute_dtype)
        out = self._forward(x2)
        return out.reshape(lead + (self.out_dim,))

    # pure-JAX f32 reference for correctness checking
    def reference(self, x):
        lead = x.shape[:-1]
        h = x.reshape(-1, x.shape[-1]).astype(jnp.float32)
        for l in range(self.depth):
            h = h @ self.weights[l] + self.biases[l]
            if self.relu_flags[l]:
                h = jnp.maximum(h, 0.0)
        return h.reshape(lead + (self.out_dim,))


if __name__ == "__main__":
    key = jax.random.PRNGKey(0)
    k_in, k_params = jax.random.split(key)

    batch, in_dim, hidden_dim, out_dim, depth = 4, 16, 32, 8, 3
    x = jax.random.normal(k_in, (batch, in_dim), jnp.float32)

    # 1) f32 mode: exact-ish check of the fused single-kernel path.
    ff32 = FeedForwardPallas(in_dim, out_dim, hidden_dim, depth=depth,
                             act_last=True, compute_dtype=jnp.float32,
                             key=k_params)
    assert ff32._use_fused, "tiny network should take the fused path"
    y = jax.block_until_ready(ff32(x))
    y_ref = ff32.reference(x)
    assert y.shape == (batch, out_dim)
    assert jnp.allclose(y, y_ref, atol=1e-5, rtol=1e-5), "fused f32 path mismatch"

    # 2) f32 tiled per-layer fallback (used when weights don't fit VMEM),
    #    with a batch that is not a multiple of 8.
    x2 = jax.random.normal(jax.random.PRNGKey(1), (13, in_dim), jnp.float32)
    y2 = jax.block_until_ready(
        ff32._forward_layered(x2.astype(ff32.compute_dtype)))
    y2_ref = ff32.reference(x2)
    assert y2.shape == (13, out_dim)
    assert jnp.allclose(y2, y2_ref, atol=1e-5, rtol=1e-5), "layered path mismatch"

    # 3) default bf16 mode (MXU-native), looser tolerance, 3-D leading dims.
    ffbf = FeedForwardPallas(in_dim, out_dim, hidden_dim, depth=depth,
                             act_last=True, key=k_params)   # bf16 default
    x3 = jax.random.normal(jax.random.PRNGKey(2), (2, 5, in_dim), jnp.float32)
    y3 = jax.block_until_ready(ffbf(x3))
    y3_ref = ffbf.reference(x3)
    assert y3.shape == (2, 5, out_dim)
    assert jnp.allclose(y3, y3_ref, atol=3e-2, rtol=3e-2), "bf16 fused path mismatch"

    print("KERNEL_OK")
</pallas_src>

<mosaic_0001>
module attributes {stable_mosaic.version = 11 : i64} {
  func.func @_fused_ffn_kernel(%arg0: i32, %arg1: memref<8x128xf32, #tpu.memory_space<vmem>>, %arg2: memref<128x128xf32, #tpu.memory_space<vmem>>, %arg3: memref<1x128xf32, #tpu.memory_space<vmem>>, %arg4: memref<128x128xf32, #tpu.memory_space<vmem>>, %arg5: memref<1x128xf32, #tpu.memory_space<vmem>>, %arg6: memref<128x128xf32, #tpu.memory_space<vmem>>, %arg7: memref<1x128xf32, #tpu.memory_space<vmem>>, %arg8: memref<8x128xf32, #tpu.memory_space<vmem>>) attributes {dimension_semantics = [#tpu.dimension_semantics<parallel>], iteration_bounds = array<i64: 1>, scalar_prefetch = 0 : i64, scratch_operands = 0 : i64, tpu.core_type = #tpu.core_type<tc>, window_params = [{transform_indices = @transform_0, window_bounds = array<i64: 8, 128>}, {pipeline_mode = #tpu.pipeline_mode<synchronous>, transform_indices = @transform_1, window_bounds = array<i64: 128, 128>}, {pipeline_mode = #tpu.pipeline_mode<synchronous>, transform_indices = @transform_2, window_bounds = array<i64: 1, 128>}, {pipeline_mode = #tpu.pipeline_mode<synchronous>, transform_indices = @transform_3, window_bounds = array<i64: 128, 128>}, {pipeline_mode = #tpu.pipeline_mode<synchronous>, transform_indices = @transform_4, window_bounds = array<i64: 1, 128>}, {pipeline_mode = #tpu.pipeline_mode<synchronous>, transform_indices = @transform_5, window_bounds = array<i64: 128, 128>}, {pipeline_mode = #tpu.pipeline_mode<synchronous>, transform_indices = @transform_6, window_bounds = array<i64: 1, 128>}, {transform_indices = @transform_7, window_bounds = array<i64: 8, 128>}]} {
    %c0 = arith.constant 0 : index
    %c0_0 = arith.constant 0 : index
    %0 = vector.load %arg1[%c0, %c0_0] : memref<8x128xf32, #tpu.memory_space<vmem>>, vector<8x128xf32>
    %c0_1 = arith.constant 0 : index
    %c0_2 = arith.constant 0 : index
    %1 = vector.load %arg2[%c0_1, %c0_2] : memref<128x128xf32, #tpu.memory_space<vmem>>, vector<128x128xf32>
    %c0_3 = arith.constant 0 : index
    %c0_4 = arith.constant 0 : index
    %2 = vector.load %arg3[%c0_3, %c0_4] : memref<1x128xf32, #tpu.memory_space<vmem>>, vector<1x128xf32>
    %cst = arith.constant dense<0.000000e+00> : vector<8x128xf32>
    %3 = tpu.matmul %0, %1, %cst {dimension_numbers = #tpu.dot_dimension_numbers<[1], [0], [0], [1], [0, 0, 1, 1], [], []>} : vector<8x128xf32>, vector<128x128xf32>, vector<8x128xf32> -> vector<8x128xf32>
    %4 = vector.broadcast %2 : vector<1x128xf32> to vector<8x128xf32>
    %5 = arith.addf %3, %4 : vector<8x128xf32>
    %cst_5 = arith.constant 0.000000e+00 : f32
    %6 = vector.broadcast %cst_5 : f32 to vector<8x128xf32>
    %7 = arith.maximumf %5, %6 : vector<8x128xf32>
    %c0_6 = arith.constant 0 : index
    %c0_7 = arith.constant 0 : index
    %8 = vector.load %arg4[%c0_6, %c0_7] : memref<128x128xf32, #tpu.memory_space<vmem>>, vector<128x128xf32>
    %c0_8 = arith.constant 0 : index
    %c0_9 = arith.constant 0 : index
    %9 = vector.load %arg5[%c0_8, %c0_9] : memref<1x128xf32, #tpu.memory_space<vmem>>, vector<1x128xf32>
    %cst_10 = arith.constant dense<0.000000e+00> : vector<8x128xf32>
    %10 = tpu.matmul %7, %8, %cst_10 {dimension_numbers = #tpu.dot_dimension_numbers<[1], [0], [0], [1], [0, 0, 1, 1], [], []>} : vector<8x128xf32>, vector<128x128xf32>, vector<8x128xf32> -> vector<8x128xf32>
    %11 = vector.broadcast %9 : vector<1x128xf32> to vector<8x128xf32>
    %12 = arith.addf %10, %11 : vector<8x128xf32>
    %cst_11 = arith.constant 0.000000e+00 : f32
    %13 = vector.broadcast %cst_11 : f32 to vector<8x128xf32>
    %14 = arith.maximumf %12, %13 : vector<8x128xf32>
    %c0_12 = arith.constant 0 : index
    %c0_13 = arith.constant 0 : index
    %15 = vector.load %arg6[%c0_12, %c0_13] : memref<128x128xf32, #tpu.memory_space<vmem>>, vector<128x128xf32>
    %c0_14 = arith.constant 0 : index
    %c0_15 = arith.constant 0 : index
    %16 = vector.load %arg7[%c0_14, %c0_15] : memref<1x128xf32, #tpu.memory_space<vmem>>, vector<1x128xf32>
    %cst_16 = arith.constant dense<0.000000e+00> : vector<8x128xf32>
    %17 = tpu.matmul %14, %15, %cst_16 {dimension_numbers = #tpu.dot_dimension_numbers<[1], [0], [0], [1], [0, 0, 1, 1], [], []>} : vector<8x128xf32>, vector<128x128xf32>, vector<8x128xf32> -> vector<8x128xf32>
    %18 = vector.broadcast %16 : vector<1x128xf32> to vector<8x128xf32>
    %19 = arith.addf %17, %18 : vector<8x128xf32>
    %cst_17 = arith.constant 0.000000e+00 : f32
    %20 = vector.broadcast %cst_17 : f32 to vector<8x128xf32>
    %21 = arith.maximumf %19, %20 : vector<8x128xf32>
    %c0_18 = arith.constant 0 : index
    %c0_19 = arith.constant 0 : index
    %22 = vector.load %arg8[%c0_18, %c0_19] : memref<8x128xf32, #tpu.memory_space<vmem>>, vector<8x128xf32>
    tpu.vector_store %arg8[%c0_18, %c0_19], %21 {strides = array<i32>} : memref<8x128xf32, #tpu.memory_space<vmem>>, vector<8x128xf32>,
    return
  }
  func.func @transform_0(%arg0: i32) -> (i32, i32) {
    %c0_i32 = arith.constant 0 : i32
    %c0_i32_0 = arith.constant 0 : i32
    return %arg0, %c0_i32 : i32, i32
  }
  func.func @transform_1(%arg0: i32) -> (i32, i32) {
    %c0_i32 = arith.constant 0 : i32
    %c0_i32_0 = arith.constant 0 : i32
    %c0_i32_1 = arith.constant 0 : i32
    return %c0_i32, %c0_i32_0 : i32, i32
  }
  func.func @transform_2(%arg0: i32) -> (i32, i32) {
    %c0_i32 = arith.constant 0 : i32
    %c0_i32_0 = arith.constant 0 : i32
    %c0_i32_1 = arith.constant 0 : i32
    return %c0_i32, %c0_i32_0 : i32, i32
  }
  func.func @transform_3(%arg0: i32) -> (i32, i32) {
    %c0_i32 = arith.constant 0 : i32
    %c0_i32_0 = arith.constant 0 : i32
    %c0_i32_1 = arith.constant 0 : i32
    return %c0_i32, %c0_i32_0 : i32, i32
  }
  func.func @transform_4(%arg0: i32) -> (i32, i32) {
    %c0_i32 = arith.constant 0 : i32
    %c0_i32_0 = arith.constant 0 : i32
    %c0_i32_1 = arith.constant 0 : i32
    return %c0_i32, %c0_i32_0 : i32, i32
  }
  func.func @transform_5(%arg0: i32) -> (i32, i32) {
    %c0_i32 = arith.constant 0 : i32
    %c0_i32_0 = arith.constant 0 : i32
    %c0_i32_1 = arith.constant 0 : i32
    return %c0_i32, %c0_i32_0 : i32, i32
  }
  func.func @transform_6(%arg0: i32) -> (i32, i32) {
    %c0_i32 = arith.constant 0 : i32
    %c0_i32_0 = arith.constant 0 : i32
    %c0_i32_1 = arith.constant 0 : i32
    return %c0_i32, %c0_i32_0 : i32, i32
  }
  func.func @transform_7(%arg0: i32) -> (i32, i32) {
    %c0_i32 = arith.constant 0 : i32
    %c0_i32_0 = arith.constant 0 : i32
    return %arg0, %c0_i32 : i32, i32
  }
}

module attributes {stable_mosaic.version = 11 : i64} {
  func.func @_fused_ffn_kernel(%arg0: i32, %arg1: memref<8x128xf32, #tpu.memory_space<vmem>>, %arg2: memref<128x128xf32, #tpu.memory_space<vmem>>, %arg3: memref<1x128xf32, #tpu.memory_space<vmem>>, %arg4: memref<128x128xf32, #tpu.memory_space<vmem>>, %arg5: memref<1x128xf32, #tpu.memory_space<vmem>>, %arg6: memref<128x128xf32, #tpu.memory_space<vmem>>, %arg7: memref<1x128xf32, #tpu.memory_space<vmem>>, %arg8: memref<8x128xf32, #tpu.memory_space<vmem>>) attributes {dimension_semantics = [#tpu.dimension_semantics<parallel>], iteration_bounds = array<i64: 1>, scalar_prefetch = 0 : i64, scratch_operands = 0 : i64, tpu.core_type = #tpu.core_type<tc>, window_params = [{transform_indices = @transform_0, window_bounds = array<i64: 8, 128>}, {pipeline_mode = #tpu.pipeline_mode<synchronous>, transform_indices = @transform_1, window_bounds = array<i64: 128, 128>}, {pipeline_mode = #tpu.pipeline_mode<synchronous>, transform_indices = @transform_2, window_bounds = array<i64: 1, 128>}, {pipeline_mode = #tpu.pipeline_mode<synchronous>, transform_indices = @transform_3, window_bounds = array<i64: 128, 128>}, {pipeline_mode = #tpu.pipeline_mode<synchronous>, transform_indices = @transform_4, window_bounds = array<i64: 1, 128>}, {pipeline_mode = #tpu.pipeline_mode<synchronous>, transform_indices = @transform_5, window_bounds = array<i64: 128, 128>}, {pipeline_mode = #tpu.pipeline_mode<synchronous>, transform_indices = @transform_6, window_bounds = array<i64: 1, 128>}, {transform_indices = @transform_7, window_bounds = array<i64: 8, 128>}]} {
    %c0 = arith.constant 0 : index
    %c0_0 = arith.constant 0 : index
    %0 = vector.load %arg1[%c0, %c0_0] : memref<8x128xf32, #tpu.memory_space<vmem>>, vector<8x128xf32>
    %c0_1 = arith.constant 0 : index
    %c0_2 = arith.constant 0 : index
    %1 = vector.load %arg2[%c0_1, %c0_2] : memref<128x128xf32, #tpu.memory_space<vmem>>, vector<128x128xf32>
    %c0_3 = arith.constant 0 : index
    %c0_4 = arith.constant 0 : index
    %2 = vector.load %arg3[%c0_3, %c0_4] : memref<1x128xf32, #tpu.memory_space<vmem>>, vector<1x128xf32>
    %cst = arith.constant dense<0.000000e+00> : vector<8x128xf32>
    %3 = tpu.matmul %0, %1, %cst {dimension_numbers = #tpu.dot_dimension_numbers<[1], [0], [0], [1], [0, 0, 1, 1], [], []>} : vector<8x128xf32>, vector<128x128xf32>, vector<8x128xf32> -> vector<8x128xf32>
    %4 = vector.broadcast %2 : vector<1x128xf32> to vector<8x128xf32>
    %5 = arith.addf %3, %4 : vector<8x128xf32>
    %cst_5 = arith.constant 0.000000e+00 : f32
    %6 = vector.broadcast %cst_5 : f32 to vector<8x128xf32>
    %7 = arith.maximumf %5, %6 : vector<8x128xf32>
    %c0_6 = arith.constant 0 : index
    %c0_7 = arith.constant 0 : index
    %8 = vector.load %arg4[%c0_6, %c0_7] : memref<128x128xf32, #tpu.memory_space<vmem>>, vector<128x128xf32>
    %c0_8 = arith.constant 0 : index
    %c0_9 = arith.constant 0 : index
    %9 = vector.load %arg5[%c0_8, %c0_9] : memref<1x128xf32, #tpu.memory_space<vmem>>, vector<1x128xf32>
    %cst_10 = arith.constant dense<0.000000e+00> : vector<8x128xf32>
    %10 = tpu.matmul %7, %8, %cst_10 {dimension_numbers = #tpu.dot_dimension_numbers<[1], [0], [0], [1], [0, 0, 1, 1], [], []>} : vector<8x128xf32>, vector<128x128xf32>, vector<8x128xf32> -> vector<8x128xf32>
    %11 = vector.broadcast %9 : vector<1x128xf32> to vector<8x128xf32>
    %12 = arith.addf %10, %11 : vector<8x128xf32>
    %cst_11 = arith.constant 0.000000e+00 : f32
    %13 = vector.broadcast %cst_11 : f32 to vector<8x128xf32>
    %14 = arith.maximumf %12, %13 : vector<8x128xf32>
    %c0_12 = arith.constant 0 : index
    %c0_13 = arith.constant 0 : index
    %15 = vector.load %arg6[%c0_12, %c0_13] : memref<128x128xf32, #tpu.memory_space<vmem>>, vector<128x128xf32>
    %c0_14 = arith.constant 0 : index
    %c0_15 = arith.constant 0 : index
    %16 = vector.load %arg7[%c0_14, %c0_15] : memref<1x128xf32, #tpu.memory_space<vmem>>, vector<1x128xf32>
    %cst_16 = arith.constant dense<0.000000e+00> : vector<8x128xf32>
    %17 = tpu.matmul %14, %15, %cst_16 {dimension_numbers = #tpu.dot_dimension_numbers<[1], [0], [0], [1], [0, 0, 1, 1], [], []>} : vector<8x128xf32>, vector<128x128xf32>, vector<8x128xf32> -> vector<8x128xf32>
    %18 = vector.broadcast %16 : vector<1x128xf32> to vector<8x128xf32>
    %19 = arith.addf %17, %18 : vector<8x128xf32>
    %cst_17 = arith.constant 0.000000e+00 : f32
    %20 = vector.broadcast %cst_17 : f32 to vector<8x128xf32>
    %21 = arith.maximumf %19, %20 : vector<8x128xf32>
    %c0_18 = arith.constant 0 : index
    %c0_19 = arith.constant 0 : index
    %22 = vector.load %arg8[%c0_18, %c0_19] : memref<8x128xf32, #tpu.memory_space<vmem>>, vector<8x128xf32>
    tpu.vector_store %arg8[%c0_18, %c0_19], %21 {strides = array<i32>} : memref<8x128xf32, #tpu.memory_space<vmem>>, vector<8x128xf32>,
    return
  }
  func.func @transform_0(%arg0: i32) -> (i32, i32) {
    %c0_i32 = arith.constant 0 : i32
    %c0_i32_0 = arith.constant 0 : i32
    return %arg0, %c0_i32 : i32, i32
  }
  func.func @transform_1(%arg0: i32) -> (i32, i32) {
    %c0_i32 = arith.constant 0 : i32
    %c0_i32_0 = arith.constant 0 : i32
    %c0_i32_1 = arith.constant 0 : i32
    return %c0_i32, %c0_i32_0 : i32, i32
  }
  func.func @transform_2(%arg0: i32) -> (i32, i32) {
    %c0_i32 = arith.constant 0 : i32
    %c0_i32_0 = arith.constant 0 : i32
    %c0_i32_1 = arith.constant 0 : i32
    return %c0_i32, %c0_i32_0 : i32, i32
  }
  func.func @transform_3(%arg0: i32) -> (i32, i32) {
    %c0_i32 = arith.constant 0 : i32
    %c0_i32_0 = arith.constant 0 : i32
    %c0_i32_1 = arith.constant 0 : i32
    return %c0_i32, %c0_i32_0 : i32, i32
  }
  func.func @transform_4(%arg0: i32) -> (i32, i32) {
    %c0_i32 = arith.constant 0 : i32
    %c0_i32_0 = arith.constant 0 : i32
    %c0_i32_1 = arith.constant 0 : i32
    return %c0_i32, %c0_i32_0 : i32, i32
  }
  func.func @transform_5(%arg0: i32) -> (i32, i32) {
    %c0_i32 = arith.constant 0 : i32
    %c0_i32_0 = arith.constant 0 : i32
    %c0_i32_1 = arith.constant 0 : i32
    return %c0_i32, %c0_i32_0 : i32, i32
  }
  func.func @transform_6(%arg0: i32) -> (i32, i32) {
    %c0_i32 = arith.constant 0 : i32
    %c0_i32_0 = arith.constant 0 : i32
    %c0_i32_1 = arith.constant 0 : i32
    return %c0_i32, %c0_i32_0 : i32, i32
  }
  func.func @transform_7(%arg0: i32) -> (i32, i32) {
    %c0_i32 = arith.constant 0 : i32
    %c0_i32_0 = arith.constant 0 : i32
    return %arg0, %c0_i32 : i32, i32
  }
}

module attributes {stable_mosaic.version = 11 : i64} {
  func.func @_linear_kernel(%arg0: i32, %arg1: i32, %arg2: i32, %arg3: memref<8x128xf32, #tpu.memory_space<vmem>>, %arg4: memref<128x128xf32, #tpu.memory_space<vmem>>, %arg5: memref<1x128xf32, #tpu.memory_space<vmem>>, %arg6: memref<8x128xf32, #tpu.memory_space<vmem>>, %arg7: memref<8x128xf32, #tpu.memory_space<vmem>>) attributes {dimension_semantics = [#tpu.dimension_semantics<parallel>, #tpu.dimension_semantics<parallel>, #tpu.dimension_semantics<arbitrary>], iteration_bounds = array<i64: 1, 1, 1>, scalar_prefetch = 0 : i64, scratch_operands = 1 : i64, tpu.core_type = #tpu.core_type<tc>, window_params = [{transform_indices = @transform_0, window_bounds = array<i64: 8, 128>}, {transform_indices = @transform_1, window_bounds = array<i64: 128, 128>}, {transform_indices = @transform_2, window_bounds = array<i64: 1, 128>}, {transform_indices = @transform_3, window_bounds = array<i64: 8, 128>}]} {
    %c0_i32 = arith.constant 0 : i32
    %0 = arith.cmpi eq, %arg2, %c0_i32 : i32
    %1 = arith.extui %0 : i1 to i32
    %c0_i32_0 = arith.constant 0 : i32
    %2 = arith.cmpi ne, %1, %c0_i32_0 : i32
    scf.if %2 {
      %c0_10 = arith.constant 0 : index
      %c0_11 = arith.constant 0 : index
      %12 = vector.load %arg5[%c0_10, %c0_11] : memref<1x128xf32, #tpu.memory_space<vmem>>, vector<1x128xf32>
      %13 = vector.shape_cast %12 : vector<1x128xf32> to vector<1x128xf32>
      %14 = vector.broadcast %13 : vector<1x128xf32> to vector<8x128xf32>
      %c0_12 = arith.constant 0 : index
      %c0_13 = arith.constant 0 : index
      %15 = vector.load %arg7[%c0_12, %c0_13] : memref<8x128xf32, #tpu.memory_space<vmem>>, vector<8x128xf32>
      tpu.vector_store %arg7[%c0_12, %c0_13], %14 {strides = array<i32>} : memref<8x128xf32, #tpu.memory_space<vmem>>, vector<8x128xf32>,
    } else {
    }
    %c0 = arith.constant 0 : index
    %c0_1 = arith.constant 0 : index
    %3 = vector.load %arg7[%c0, %c0_1] : memref<8x128xf32, #tpu.memory_space<vmem>>, vector<8x128xf32>
    %c0_2 = arith.constant 0 : index
    %c0_3 = arith.constant 0 : index
    %4 = vector.load %arg3[%c0_2, %c0_3] : memref<8x128xf32, #tpu.memory_space<vmem>>, vector<8x128xf32>
    %c0_4 = arith.constant 0 : index
    %c0_5 = arith.constant 0 : index
    %5 = vector.load %arg4[%c0_4, %c0_5] : memref<128x128xf32, #tpu.memory_space<vmem>>, vector<128x128xf32>
    %cst = arith.constant dense<0.000000e+00> : vector<8x128xf32>
    %6 = tpu.matmul %4, %5, %cst {dimension_numbers = #tpu.dot_dimension_numbers<[1], [0], [0], [1], [0, 0, 1, 1], [], []>} : vector<8x128xf32>, vector<128x128xf32>, vector<8x128xf32> -> vector<8x128xf32>
    %7 = arith.addf %3, %6 : vector<8x128xf32>
    %c0_6 = arith.constant 0 : index
    %c0_7 = arith.constant 0 : index
    %8 = vector.load %arg7[%c0_6, %c0_7] : memref<8x128xf32, #tpu.memory_space<vmem>>, vector<8x128xf32>
    tpu.vector_store %arg7[%c0_6, %c0_7], %7 {strides = array<i32>} : memref<8x128xf32, #tpu.memory_space<vmem>>, vector<8x128xf32>,
    %c0_i32_8 = arith.constant 0 : i32
    %9 = arith.cmpi eq, %arg2, %c0_i32_8 : i32
    %10 = arith.extui %9 : i1 to i32
    %c0_i32_9 = arith.constant 0 : i32
    %11 = arith.cmpi ne, %10, %c0_i32_9 : i32
    scf.if %11 {
      %c0_10 = arith.constant 0 : index
      %c0_11 = arith.constant 0 : index
      %12 = vector.load %arg7[%c0_10, %c0_11] : memref<8x128xf32, #tpu.memory_space<vmem>>, vector<8x128xf32>
      %cst_12 = arith.constant 0.000000e+00 : f32
      %13 = vector.broadcast %cst_12 : f32 to vector<8x128xf32>
      %14 = arith.maximumf %12, %13 : vector<8x128xf32>
      %c0_13 = arith.constant 0 : index
      %c0_14 = arith.constant 0 : index
      %15 = vector.load %arg6[%c0_13, %c0_14] : memref<8x128xf32, #tpu.memory_space<vmem>>, vector<8x128xf32>
      tpu.vector_store %arg6[%c0_13, %c0_14], %14 {strides = array<i32>} : memref<8x128xf32, #tpu.memory_space<vmem>>, vector<8x128xf32>,
    } else {
    }
    return
  }
  func.func @transform_0(%arg0: i32, %arg1: i32, %arg2: i32) -> (i32, i32) {
    %c0_i32 = arith.constant 0 : i32
    return %arg0, %arg2 : i32, i32
  }
  func.func @transform_1(%arg0: i32, %arg1: i32, %arg2: i32) -> (i32, i32) {
    %c0_i32 = arith.constant 0 : i32
    return %arg2, %arg1 : i32, i32
  }
  func.func @transform_2(%arg0: i32, %arg1: i32, %arg2: i32) -> (i32, i32) {
    %c0_i32 = arith.constant 0 : i32
    %c0_i32_0 = arith.constant 0 : i32
    return %c0_i32, %arg1 : i32, i32
  }
  func.func @transform_3(%arg0: i32, %arg1: i32, %arg2: i32) -> (i32, i32) {
    %c0_i32 = arith.constant 0 : i32
    return %arg0, %arg1 : i32, i32
  }
}

</mosaic_0001>

<bundles_post_ra>
// kernel: tpu_custom_call.1
= control target key start
LH: loop header
LB: loop body
LE: loop exit
PB: predicated region body
PF: predicated region fallthrough
CT: control target
= control target key end

     0   :  { %12 = vsyncpa [#allocation3], 0  ;;  %s898_s0 = inlined_call_operand.hbm [shape: f32[8,128], index: 0, kind: input, shape index: {}]   ;;  %s899_s1 = inlined_call_operand.hbm [shape: f32[128,128], index: 1, kind: input, shape index: {}]   ;;  %s900_s2 = inlined_call_operand.vmem [shape: f32[1,128], index: 2, kind: input, shape index: {}]   ;;  %s901_s3 = inlined_call_operand.hbm [shape: f32[128,128], index: 3, kind: input, shape index: {}]   ;;  %s902_s4 = inlined_call_operand.vmem [shape: f32[1,128], index: 4, kind: input, shape index: {}]   ;;  %s903_s5 = inlined_call_operand.hbm [shape: f32[128,128], index: 5, kind: input, shape index: {}]   ;;  %s904_s6 = inlined_call_operand.vmem [shape: f32[1,128], index: 6, kind: input, shape index: {}]   ;;  %s905_s7 = inlined_call_operand.hbm [shape: f32[8,128], index: 7, kind: output, shape index: {}]  }
   0x1   :  { %13 = vsyncpa [#allocation6], 0 }
   0x2   :  { %14 = vsyncpa [#allocation9], 0 }
   0x3   :  { %15 = vsyncpa [#allocation4], 0  ;;  %s740_s24 = smov [#allocation5]   ;;  %s622_s28 = scalar_lea.hbm %s899_s1, 2048 }
   0x4   :  { %s31_s25 = sshll.u32 %s740_s24, 4  ;;  %p623_p0 = scmp.ne.s32.totalorder %s899_s1, %s622_s28  ;;  %s32_s25 = int_to_ptr.vmem [resolvable:$true] %s31_s25 }
   0x5   :  { %p626_p1 = scmp.lt.u32.totalorder %s622_s28, %s899_s1 }
   0x7   :  { %p628_p2 = pnand %p626_p1, %p623_p0 }
   0x9   :  { %631 = shalt.err (!%p628_p2)
}
   0xa   :  { %s632_s10 = scalar_lea.vmem %s32_s25, 2048  ;;  %p637_p4 = scmp.lt.s32.totalorder %s32_s25, %s32_s25 }
   0xb   :  { %p633_p3 = scmp.ne.s32.totalorder %s32_s25, %s632_s10  ;;  %p638_p5 = scmp.lt.s32.totalorder %s632_s10, %s632_s10 }
   0xd   :  { %p639_p6 = por %p638_p5, %p637_p4 }
   0xf   :  { %p640_p7 = pnand %p639_p6, %p633_p3 }
  0x11   :  { %643 = shalt.err (!%p640_p7)
}
  0x12   :  { %s741_s11 = smov 128   ;;  %s742_s12 = smov 8  }
  0x13   :  { %37 = dma.hbm_to_vmem [thread:$0]  %s899_s1, 2048, %s32_s25, [#allocation6], %s741_s11, %s741_s11, %s742_s12  }
  0x14   :  { %s743_s15 = smov [#allocation2]   ;;  %s744_s17 = smov [#allocation7]  }
  0x15   :  { %s22_s16 = sshll.u32 %s743_s15, 4  ;;  %s45_s18 = sshll.u32 %s744_s17, 4  ;;  %s23_s16 = int_to_ptr.vmem [resolvable:$true] %s22_s16  ;;  %s46_s18 = int_to_ptr.vmem [resolvable:$true] %s45_s18 }
  0x16   :  { %s644_s21 = scalar_lea.hbm %s898_s0, 128 }
  0x17   :  { %p645_p8 = scmp.ne.s32.totalorder %s898_s0, %s644_s21  ;;  %p648_p9 = scmp.lt.u32.totalorder %s644_s21, %s898_s0 }
  0x19   :  { %p650_p10 = pnand %p648_p9, %p645_p8 }
  0x1b   :  { %653 = shalt.err (!%p650_p10)
}
  0x1c   :  { %s654_s1 = scalar_lea.vmem %s23_s16, 128  ;;  %p659_p12 = scmp.lt.s32.totalorder %s23_s16, %s23_s16 }
  0x1d   :  { %p655_p11 = scmp.ne.s32.totalorder %s23_s16, %s654_s1  ;;  %p660_p13 = scmp.lt.s32.totalorder %s654_s1, %s654_s1 }
  0x1f   :  { %p661_p0 = por %p660_p13, %p659_p12 }
  0x21   :  { %p662_p1 = pnand %p661_p0, %p655_p11 }
  0x23   :  { %665 = shalt.err (!%p662_p1)
}
  0x24   :  { %25 = dma.hbm_to_vmem [thread:$0]  %s898_s0, 128, %s23_s16, [#allocation3]  }
  0x25   :  { %s666_s30 = scalar_lea.hbm %s901_s3, 2048 }
  0x26   :  { %p667_p2 = scmp.ne.s32.totalorder %s901_s3, %s666_s30  ;;  %p670_p3 = scmp.lt.u32.totalorder %s666_s30, %s901_s3 }
  0x28   :  { %p672_p4 = pnand %p670_p3, %p667_p2 }
  0x2a   :  { %675 = shalt.err (!%p672_p4)
}
  0x2b   :  { %s676_s14 = scalar_lea.vmem %s46_s18, 2048  ;;  %p681_p6 = scmp.lt.s32.totalorder %s46_s18, %s46_s18 }
  0x2c   :  { %p677_p5 = scmp.ne.s32.totalorder %s46_s18, %s676_s14  ;;  %p682_p7 = scmp.lt.s32.totalorder %s676_s14, %s676_s14 }
  0x2e   :  { %p683_p8 = por %p682_p7, %p681_p6 }
  0x30   :  { %p684_p9 = pnand %p683_p8, %p677_p5 }
  0x32   :  { %687 = shalt.err (!%p684_p9)
}
  0x33   :  { %51 = dma.hbm_to_vmem [thread:$0]  %s901_s3, 2048, %s46_s18, [#allocation6], %s741_s11, %s741_s11, %s742_s12  }
  0x34   :  { %s745_s16 = smov [#allocation8]   ;;  %s688_s21 = scalar_lea.hbm %s903_s5, 2048 }
  0x35   :  { %s59_s17 = sshll.u32 %s745_s16, 4  ;;  %p689_p10 = scmp.ne.s32.totalorder %s903_s5, %s688_s21  ;;  %s60_s17 = int_to_ptr.vmem [resolvable:$true] %s59_s17 }
  0x36   :  { %p692_p11 = scmp.lt.u32.totalorder %s688_s21, %s903_s5 }
  0x38   :  { %p694_p12 = pnand %p692_p11, %p689_p10 }
  0x3a   :  { %697 = shalt.err (!%p694_p12)
}
  0x3b   :  { %s698_s1 = scalar_lea.vmem %s60_s17, 2048  ;;  %p703_p0 = scmp.lt.s32.totalorder %s60_s17, %s60_s17 }
  0x3c   :  { %p699_p13 = scmp.ne.s32.totalorder %s60_s17, %s698_s1  ;;  %p704_p1 = scmp.lt.s32.totalorder %s698_s1, %s698_s1 }
  0x3e   :  { %p705_p2 = por %p704_p1, %p703_p0 }
  0x40   :  { %p706_p3 = pnand %p705_p2, %p699_p13 }
  0x42   :  { %709 = shalt.err (!%p706_p3)
}
  0x43   :  { %65 = dma.hbm_to_vmem [thread:$0]  %s903_s5, 2048, %s60_s17, [#allocation9], %s741_s11, %s741_s11, %s742_s12  }
  0x44   :  { %732 = dma.done.wait [#allocation3], 128  }
  0x45   :  { %733 = vsyncadd [#allocation3], 4294967168 }
  0x46   :  { %734 = dma.done.wait [#allocation6], 4096  }
  0x47   :  { %735 = vsyncadd [#allocation6], 4294963200 }
  0x48   :  { %736 = dma.done.wait [#allocation9], 2048  }
  0x49   :  { %737 = vsyncadd [#allocation9], 4294965248  ;;  %v746_v0 = vmov 0.0|0.0   ;;  %vm747_vm0 = vmmov 0   ;;  %v748_v1 = vmov 0.0   ;;  %v81_v2 = vld [vmem:[#allocation5] sm:$0xff] }
  0x4a   :  { %540 = vmatprep.subr.bf16.mxu0 %v746_v0  ;;  %467 = vmatprep.mubr.msk.f32.mxu0 %vm747_vm0, %v748_v1  ;;  %v82_v3 = vld [vmem:[#allocation5 + $0x8] sm:$0xff]  ;;  %v83_v4 = vld [vmem:[#allocation5 + $0x10] sm:$0xff]  ;;  %v84_v6 = vld [vmem:[#allocation5 + $0x18] sm:$0xff]  ;;  %s749_s28 = smov [#allocation10]  }
  0x4b   :  { %564 = vmatprep.subr.bf16.mxu1 %v746_v0  ;;  %502 = vmatprep.mubr.msk.f32.mxu1 %vm747_vm0, %v748_v1  ;;  %v541_v5 = vpack.c.bf16 %v82_v3, %v81_v2  ;;  %v544_v7 = vpack.c.bf16 %v84_v6, %v83_v4  ;;  %v85_v8 = vld [vmem:[#allocation5 + $0x20] sm:$0xff]  ;;  %v86_v9 = vld [vmem:[#allocation5 + $0x28] sm:$0xff]  ;;  %v177_v12 = vld [vmem:[#allocation7 + $0x10] sm:$0xff]  ;;  %s370_s29 = sshll.u32 %s749_s28, 4  ;;  %s371_s29 = int_to_ptr.vmem [resolvable:$true] %s370_s29 }
  0x4c   :  { %v175_v10 = vld [vmem:[#allocation7] sm:$0xff]  ;;  %v176_v11 = vld [vmem:[#allocation7 + $0x8] sm:$0xff]  ;;  %v178_v13 = vld [vmem:[#allocation7 + $0x18] sm:$0xff]  ;;  %v547_v14 = vpack.c.bf16 %v86_v9, %v85_v8  ;;  %s710_s30 = scalar_lea.vmem %s371_s29, 128  ;;  %p715_p5 = scmp.lt.s32.totalorder %s371_s29, %s371_s29 }
  0x4d   :  { %542 = vmatpush3.bf16.msra.mxu0 %v541_v5  ;;  %v565_v15 = vpack.c.bf16 %v176_v11, %v175_v10  ;;  %v87_v16 = vld [vmem:[#allocation5 + $0x30] sm:$0xff]  ;;  %v88_v17 = vld [vmem:[#allocation5 + $0x38] sm:$0xff]  ;;  %v568_v18 = vpack.c.bf16 %v178_v13, %v177_v12  ;;  %v179_v19 = vld [vmem:[#allocation7 + $0x20] sm:$0xff]  ;;  %p711_p4 = scmp.ne.s32.totalorder %s371_s29, %s710_s30  ;;  %p716_p6 = scmp.lt.s32.totalorder %s710_s30, %s710_s30 }
  0x4e   :  { %543 = vmatprep.subr.bf16.mxu0 %v746_v0  ;;  %v180_v20 = vld [vmem:[#allocation7 + $0x28] sm:$0xff]  ;;  %v550_v21 = vpack.c.bf16 %v88_v17, %v87_v16  ;;  %v89_v22 = vld [vmem:[#allocation5 + $0x40] sm:$0xff]  ;;  %v181_v25 = vld [vmem:[#allocation7 + $0x30] sm:$0xff] }
  0x4f   :  { %566 = vmatpush3.bf16.msra.mxu1 %v565_v15  ;;  %v90_v23 = vld [vmem:[#allocation5 + $0x48] sm:$0xff]  ;;  %v571_v24 = vpack.c.bf16 %v180_v20, %v179_v19  ;;  %v182_v26 = vld [vmem:[#allocation7 + $0x38] sm:$0xff]  ;;  %v91_v28 = vld [vmem:[#allocation5 + $0x50] sm:$0xff]  ;;  %p717_p7 = por %p716_p6, %p715_p5 }
  0x50   :  { %567 = vmatprep.subr.bf16.mxu1 %v746_v0  ;;  %v553_v27 = vpack.c.bf16 %v90_v23, %v89_v22  ;;  %v92_v29 = vld [vmem:[#allocation5 + $0x58] sm:$0xff]  ;;  %v574_v30 = vpack.c.bf16 %v182_v26, %v181_v25  ;;  %v183_v31 = vld [vmem:[#allocation7 + $0x40] sm:$0xff]  ;;  %v184_v32 = vld [vmem:[#allocation7 + $0x48] sm:$0xff] }
  0x51   :  { %545 = vmatpush3.bf16.msra.mxu0 %v544_v7  ;;  %v556_v33 = vpack.c.bf16 %v92_v29, %v91_v28  ;;  %v93_v34 = vld [vmem:[#allocation5 + $0x60] sm:$0xff]  ;;  %v94_v35 = vld [vmem:[#allocation5 + $0x68] sm:$0xff]  ;;  %v577_v36 = vpack.c.bf16 %v184_v32, %v183_v31  ;;  %v185_v37 = vld [vmem:[#allocation7 + $0x50] sm:$0xff]  ;;  %p718_p8 = pnand %p717_p7, %p711_p4 }
  0x52   :  { %546 = vmatprep.subr.bf16.mxu0 %v746_v0  ;;  %v186_v38 = vld [vmem:[#allocation7 + $0x58] sm:$0xff]  ;;  %v559_v39 = vpack.c.bf16 %v94_v35, %v93_v34  ;;  %v95_v40 = vld [vmem:[#allocation5 + $0x70] sm:$0xff]  ;;  %v187_v43 = vld [vmem:[#allocation7 + $0x60] sm:$0xff] }
  0x53   :  { %569 = vmatpush3.bf16.msra.mxu1 %v568_v18  ;;  %v96_v41 = vld [vmem:[#allocation5 + $0x78] sm:$0xff]  ;;  %v580_v42 = vpack.c.bf16 %v186_v38, %v185_v37  ;;  %v188_v44 = vld [vmem:[#allocation7 + $0x68] sm:$0xff]  ;;  %v189_v48 = vld [vmem:[#allocation7 + $0x70] sm:$0xff] }
  0x54   :  { %570 = vmatprep.subr.bf16.mxu1 %v746_v0  ;;  %v562_v45 = vpack.c.bf16 %v96_v41, %v95_v40  ;;  %v583_v46 = vpack.c.bf16 %v188_v44, %v187_v43  ;;  %v80_v47 = vld [vmem:[#allocation2] sm:$0xff]  ;;  %v269_v51 = vld [vmem:[#allocation8] sm:$0xff]  ;;  %v270_v52 = vld [vmem:[#allocation8 + $0x8] sm:$0xff] }
  0x55   :  { %548 = vmatpush3.bf16.msra.mxu0 %v547_v14  ;;  %v190_v49 = vld [vmem:[#allocation7 + $0x78] sm:$0xff]  ;;  %v271_v53 = vld [vmem:[#allocation8 + $0x10] sm:$0xff]  ;;  %v589_v54 = vpack.c.bf16 %v270_v52, %v269_v51  ;;  %v273_v57 = vld [vmem:[#allocation8 + $0x20] sm:$0xff] }
  0x56   :  { %549 = vmatprep.subr.bf16.mxu0 %v746_v0  ;;  %v586_v50 = vpack.c.bf16 %v190_v49, %v189_v48  ;;  %v272_v55 = vld [vmem:[#allocation8 + $0x18] sm:$0xff]  ;;  %v274_v58 = vld [vmem:[#allocation8 + $0x28] sm:$0xff]  ;;  %v275_v60 = vld [vmem:[#allocation8 + $0x30] sm:$0xff] }
  0x57   :  { %572 = vmatpush3.bf16.msra.mxu1 %v571_v24  ;;  %v592_v56 = vpack.c.bf16 %v272_v55, %v271_v53  ;;  %v595_v59 = vpack.c.bf16 %v274_v58, %v273_v57  ;;  %v276_v61 = vld [vmem:[#allocation8 + $0x38] sm:$0xff]  ;;  %v277_v63 = vld [vmem:[#allocation8 + $0x40] sm:$0xff]  ;;  %v279_v3 = vld [vmem:[#allocation8 + $0x50] sm:$0xff] }
  0x58   :  { %573 = vmatprep.subr.bf16.mxu1 %v746_v0  ;;  %v598_v62 = vpack.c.bf16 %v276_v61, %v275_v60  ;;  %v280_v4 = vld [vmem:[#allocation8 + $0x58] sm:$0xff]  ;;  %v281_v6 = vld [vmem:[#allocation8 + $0x60] sm:$0xff]  ;;  %v282_v7 = vld [vmem:[#allocation8 + $0x68] sm:$0xff] }
  0x59   :  { %551 = vmatpush3.bf16.msra.mxu0 %v550_v21  ;;  %v604_v5 = vpack.c.bf16 %v280_v4, %v279_v3  ;;  %v607_v8 = vpack.c.bf16 %v282_v7, %v281_v6  ;;  %v381_v9 = vld [vmem:[%s900_s2] ss:$0 sm:$0xff]  ;;  %v283_v14 = vld [vmem:[#allocation8 + $0x70] sm:$0xff] }
  0x5a   :  { %552 = vmatprep.subr.bf16.mxu0 %v746_v0  ;;  %v284_v15 = vld [vmem:[#allocation8 + $0x78] sm:$0xff] }
  0x5b   :  { %575 = vmatpush3.bf16.msra.mxu1 %v574_v30  ;;  %v610_v16 = vpack.c.bf16 %v284_v15, %v283_v14  ;;  %v382_v17 = vld [vmem:[%s902_s4] ss:$0 sm:$0xff] }
  0x5c   :  { %576 = vmatprep.subr.bf16.mxu1 %v746_v0  ;;  %v383_v21 = vld [vmem:[%s904_s6] ss:$0 sm:$0xff] }
  0x5d   :  { %554 = vmatpush3.bf16.msra.mxu0 %v553_v27 }
  0x5e   :  { %555 = vmatprep.subr.bf16.mxu0 %v746_v0 }
  0x5f   :  { %578 = vmatpush3.bf16.msra.mxu1 %v577_v36 }
  0x60   :  { %579 = vmatprep.subr.bf16.mxu1 %v746_v0 }
  0x61   :  { %557 = vmatpush3.bf16.msra.mxu0 %v556_v33 }
  0x62   :  { %558 = vmatprep.subr.bf16.mxu0 %v746_v0 }
  0x63   :  { %581 = vmatpush3.bf16.msra.mxu1 %v580_v42 }
  0x64   :  { %582 = vmatprep.subr.bf16.mxu1 %v746_v0 }
  0x65   :  { %560 = vmatpush3.bf16.msra.mxu0 %v559_v39 }
  0x66   :  { %561 = vmatprep.subr.bf16.mxu0 %v746_v0 }
  0x67   :  { %584 = vmatpush3.bf16.msra.mxu1 %v583_v46 }
  0x68   :  { %585 = vmatprep.subr.bf16.mxu1 %v746_v0 }
  0x69   :  { %563 = vmatpush3.bf16.msra.mxu0 %v562_v45 }
  0x6a   :  { %588 = vmatprep.subr.bf16.mxu0 %v746_v0 }
  0x6b   :  { %587 = vmatpush3.bf16.msra.mxu1 %v586_v50 }
  0x6c   :  { %468 = vmatmul.mubr.f32.vlgmr.msra.gmra.mrb[0].mxu0 %v80_v47 }
  0x6d   :  { %537 = vmatprep.mubr.msk.f32.mxu0 %vm747_vm0, %v748_v1  ;;  %590 = vmatpush3.bf16.msra.mxu0 %v589_v54  ;;  %v278_v1 = vld [vmem:[#allocation8 + $0x48] sm:$0xff] }
  0x6e   :  { %591 = vmatprep.subr.bf16.mxu0 %v746_v0  ;;  %v601_v2 = vpack.c.bf16 %v278_v1, %v277_v63 }
  0x71   :  { %593 = vmatpush3.bf16.msra.mxu0 %v592_v56 }
  0x72   :  { %594 = vmatprep.subr.bf16.mxu0 %v746_v0 }
  0x75   :  { %596 = vmatpush3.bf16.msra.mxu0 %v595_v59 }
  0x76   :  { %597 = vmatprep.subr.bf16.mxu0 %v746_v0 }
  0x79   :  { %599 = vmatpush3.bf16.msra.mxu0 %v598_v62 }
  0x7a   :  { %600 = vmatprep.subr.bf16.mxu0 %v746_v0 }
  0x7d   :  { %602 = vmatpush3.bf16.msra.mxu0 %v601_v2 }
  0x7e   :  { %603 = vmatprep.subr.bf16.mxu0 %v746_v0 }
  0x81   :  { %605 = vmatpush3.bf16.msra.mxu0 %v604_v5 }
  0x82   :  { %606 = vmatprep.subr.bf16.mxu0 %v746_v0 }
  0x85   :  { %608 = vmatpush3.bf16.msra.mxu0 %v607_v8 }
  0x86   :  { %609 = vmatprep.subr.bf16.mxu0 %v746_v0 }
  0x89   :  { %611 = vmatpush3.bf16.msra.mxu0 %v610_v16 }
 0x13f   :  { %v170_v10 = vpop.f32.mrb[0].mxu0 }
 0x140   :  { %v171_v11 = vadd.f32 %v381_v9, %v170_v10  ;;  %v469_v12 = vpop.f32.mrb[1].mxu0 }
 0x142   :  { %v174_v13 = vmax.f32 %v171_v11, 0.0 }
 0x144   :  { %503 = vmatmul.mubr.f32.vlgmr.msra.gmra.mrb[0].mxu1 %v174_v13 }
 0x217   :  { %v264_v18 = vpop.f32.mrb[0].mxu1 }
 0x218   :  { %v265_v19 = vadd.f32 %v382_v17, %v264_v18  ;;  %v504_v0 = vpop.f32.mrb[1].mxu1 }
 0x21a   :  { %v268_v20 = vmax.f32 %v265_v19, 0.0 }
 0x21c   :  { %538 = vmatmul.mubr.f32.vlgmr.msra.gmra.mrb[2].mxu0 %v268_v20 }
 0x2ef   :  { %v358_v22 = vpop.f32.mrb[2].mxu0 }
 0x2f0   :  { %v359_v23 = vadd.f32 %v383_v21, %v358_v22  ;;  %v539_v24 = vpop.f32.mrb[3].mxu0 }
 0x2f2   :  { %v362_v25 = vmax.f32 %v359_v23, 0.0 }
 0x2f4   :  { %363 = vst [vmem:[#allocation10] sm:$0xff] %v362_v25 }
 0x2f5   :  { %721 = shalt.err (!%p718_p8)
}
 0x2f6   :  { %s722_s9 = scalar_lea.hbm %s905_s7, 128 }
 0x2f7   :  { %p723_p9 = scmp.ne.s32.totalorder %s905_s7, %s722_s9  ;;  %p726_p10 = scmp.lt.u32.totalorder %s722_s9, %s905_s7 }
 0x2f9   :  { %p728_p11 = pnand %p726_p10, %p723_p9 }
 0x2fb   :  { %731 = shalt.err (!%p728_p11)
}
 0x2fc   :  { %373 = dma.vmem_to_hbm [thread:$0]  %s371_s29, 128, %s905_s7, [#allocation4]  }
 0x2fd   :  { %738 = dma.done.wait [#allocation4], 128  }
 0x2fe   :  { %739 = vsyncadd [#allocation4], 4294967168 }
 0x2ff   :  { %377 = vsyncpa [#allocation3], 1 }
 0x300   :  { %378 = vsyncpa [#allocation6], 1 }
 0x301   :  { %379 = vsyncpa [#allocation9], 1 }
 0x302   :  { %380 = vsyncpa [#allocation4], 1 }

// kernel: tpu_custom_call.1
= control target key start
LH: loop header
LB: loop body
LE: loop exit
PB: predicated region body
PF: predicated region fallthrough
CT: control target
= control target key end

     0   :  { %12 = vsyncpa [#allocation3], 0  ;;  %s898_s0 = inlined_call_operand.hbm [shape: f32[8,128], index: 0, kind: input, shape index: {}]   ;;  %s899_s1 = inlined_call_operand.hbm [shape: f32[128,128], index: 1, kind: input, shape index: {}]   ;;  %s900_s2 = inlined_call_operand.vmem [shape: f32[1,128], index: 2, kind: input, shape index: {}]   ;;  %s901_s3 = inlined_call_operand.hbm [shape: f32[128,128], index: 3, kind: input, shape index: {}]   ;;  %s902_s4 = inlined_call_operand.vmem [shape: f32[1,128], index: 4, kind: input, shape index: {}]   ;;  %s903_s5 = inlined_call_operand.hbm [shape: f32[128,128], index: 5, kind: input, shape index: {}]   ;;  %s904_s6 = inlined_call_operand.vmem [shape: f32[1,128], index: 6, kind: input, shape index: {}]   ;;  %s905_s7 = inlined_call_operand.hbm [shape: f32[8,128], index: 7, kind: output, shape index: {}]  }
   0x1   :  { %13 = vsyncpa [#allocation6], 0 }
   0x2   :  { %14 = vsyncpa [#allocation9], 0 }
   0x3   :  { %15 = vsyncpa [#allocation4], 0  ;;  %s740_s24 = smov [#allocation5]   ;;  %s622_s28 = scalar_lea.hbm %s899_s1, 2048 }
   0x4   :  { %s31_s25 = sshll.u32 %s740_s24, 4  ;;  %p623_p0 = scmp.ne.s32.totalorder %s899_s1, %s622_s28  ;;  %s32_s25 = int_to_ptr.vmem [resolvable:$true] %s31_s25 }
   0x5   :  { %p626_p1 = scmp.lt.u32.totalorder %s622_s28, %s899_s1 }
   0x7   :  { %p628_p2 = pnand %p626_p1, %p623_p0 }
   0x9   :  { %631 = shalt.err (!%p628_p2)
}
   0xa   :  { %s632_s10 = scalar_lea.vmem %s32_s25, 2048  ;;  %p637_p4 = scmp.lt.s32.totalorder %s32_s25, %s32_s25 }
   0xb   :  { %p633_p3 = scmp.ne.s32.totalorder %s32_s25, %s632_s10  ;;  %p638_p5 = scmp.lt.s32.totalorder %s632_s10, %s632_s10 }
   0xd   :  { %p639_p6 = por %p638_p5, %p637_p4 }
   0xf   :  { %p640_p7 = pnand %p639_p6, %p633_p3 }
  0x11   :  { %643 = shalt.err (!%p640_p7)
}
  0x12   :  { %s741_s11 = smov 128   ;;  %s742_s12 = smov 8  }
  0x13   :  { %37 = dma.hbm_to_vmem [thread:$0]  %s899_s1, 2048, %s32_s25, [#allocation6], %s741_s11, %s741_s11, %s742_s12  }
  0x14   :  { %s743_s15 = smov [#allocation2]   ;;  %s744_s17 = smov [#allocation7]  }
  0x15   :  { %s22_s16 = sshll.u32 %s743_s15, 4  ;;  %s45_s18 = sshll.u32 %s744_s17, 4  ;;  %s23_s16 = int_to_ptr.vmem [resolvable:$true] %s22_s16  ;;  %s46_s18 = int_to_ptr.vmem [resolvable:$true] %s45_s18 }
  0x16   :  { %s644_s21 = scalar_lea.hbm %s898_s0, 128 }
  0x17   :  { %p645_p8 = scmp.ne.s32.totalorder %s898_s0, %s644_s21  ;;  %p648_p9 = scmp.lt.u32.totalorder %s644_s21, %s898_s0 }
  0x19   :  { %p650_p10 = pnand %p648_p9, %p645_p8 }
  0x1b   :  { %653 = shalt.err (!%p650_p10)
}
  0x1c   :  { %s654_s1 = scalar_lea.vmem %s23_s16, 128  ;;  %p659_p12 = scmp.lt.s32.totalorder %s23_s16, %s23_s16 }
  0x1d   :  { %p655_p11 = scmp.ne.s32.totalorder %s23_s16, %s654_s1  ;;  %p660_p13 = scmp.lt.s32.totalorder %s654_s1, %s654_s1 }
  0x1f   :  { %p661_p0 = por %p660_p13, %p659_p12 }
  0x21   :  { %p662_p1 = pnand %p661_p0, %p655_p11 }
  0x23   :  { %665 = shalt.err (!%p662_p1)
}
  0x24   :  { %25 = dma.hbm_to_vmem [thread:$0]  %s898_s0, 128, %s23_s16, [#allocation3]  }
  0x25   :  { %s666_s30 = scalar_lea.hbm %s901_s3, 2048 }
  0x26   :  { %p667_p2 = scmp.ne.s32.totalorder %s901_s3, %s666_s30  ;;  %p670_p3 = scmp.lt.u32.totalorder %s666_s30, %s901_s3 }
  0x28   :  { %p672_p4 = pnand %p670_p3, %p667_p2 }
  0x2a   :  { %675 = shalt.err (!%p672_p4)
}
  0x2b   :  { %s676_s14 = scalar_lea.vmem %s46_s18, 2048  ;;  %p681_p6 = scmp.lt.s32.totalorder %s46_s18, %s46_s18 }
  0x2c   :  { %p677_p5 = scmp.ne.s32.totalorder %s46_s18, %s676_s14  ;;  %p682_p7 = scmp.lt.s32.totalorder %s676_s14, %s676_s14 }
  0x2e   :  { %p683_p8 = por %p682_p7, %p681_p6 }
  0x30   :  { %p684_p9 = pnand %p683_p8, %p677_p5 }
  0x32   :  { %687 = shalt.err (!%p684_p9)
}
  0x33   :  { %51 = dma.hbm_to_vmem [thread:$0]  %s901_s3, 2048, %s46_s18, [#allocation6], %s741_s11, %s741_s11, %s742_s12  }
  0x34   :  { %s745_s16 = smov [#allocation8]   ;;  %s688_s21 = scalar_lea.hbm %s903_s5, 2048 }
  0x35   :  { %s59_s17 = sshll.u32 %s745_s16, 4  ;;  %p689_p10 = scmp.ne.s32.totalorder %s903_s5, %s688_s21  ;;  %s60_s17 = int_to_ptr.vmem [resolvable:$true] %s59_s17 }
  0x36   :  { %p692_p11 = scmp.lt.u32.totalorder %s688_s21, %s903_s5 }
  0x38   :  { %p694_p12 = pnand %p692_p11, %p689_p10 }
  0x3a   :  { %697 = shalt.err (!%p694_p12)
}
  0x3b   :  { %s698_s1 = scalar_lea.vmem %s60_s17, 2048  ;;  %p703_p0 = scmp.lt.s32.totalorder %s60_s17, %s60_s17 }
  0x3c   :  { %p699_p13 = scmp.ne.s32.totalorder %s60_s17, %s698_s1  ;;  %p704_p1 = scmp.lt.s32.totalorder %s698_s1, %s698_s1 }
  0x3e   :  { %p705_p2 = por %p704_p1, %p703_p0 }
  0x40   :  { %p706_p3 = pnand %p705_p2, %p699_p13 }
  0x42   :  { %709 = shalt.err (!%p706_p3)
}
  0x43   :  { %65 = dma.hbm_to_vmem [thread:$0]  %s903_s5, 2048, %s60_s17, [#allocation9], %s741_s11, %s741_s11, %s742_s12  }
  0x44   :  { %732 = dma.done.wait [#allocation3], 128  }
  0x45   :  { %733 = vsyncadd [#allocation3], 4294967168 }
  0x46   :  { %734 = dma.done.wait [#allocation6], 4096  }
  0x47   :  { %735 = vsyncadd [#allocation6], 4294963200 }
  0x48   :  { %736 = dma.done.wait [#allocation9], 2048  }
  0x49   :  { %737 = vsyncadd [#allocation9], 4294965248  ;;  %v746_v0 = vmov 0.0|0.0   ;;  %vm747_vm0 = vmmov 0   ;;  %v748_v1 = vmov 0.0   ;;  %v81_v2 = vld [vmem:[#allocation5] sm:$0xff] }
  0x4a   :  { %540 = vmatprep.subr.bf16.mxu0 %v746_v0  ;;  %467 = vmatprep.mubr.msk.f32.mxu0 %vm747_vm0, %v748_v1  ;;  %v82_v3 = vld [vmem:[#allocation5 + $0x8] sm:$0xff]  ;;  %v83_v4 = vld [vmem:[#allocation5 + $0x10] sm:$0xff]  ;;  %v84_v6 = vld [vmem:[#allocation5 + $0x18] sm:$0xff]  ;;  %s749_s28 = smov [#allocation10]  }
  0x4b   :  { %564 = vmatprep.subr.bf16.mxu1 %v746_v0  ;;  %502 = vmatprep.mubr.msk.f32.mxu1 %vm747_vm0, %v748_v1  ;;  %v541_v5 = vpack.c.bf16 %v82_v3, %v81_v2  ;;  %v544_v7 = vpack.c.bf16 %v84_v6, %v83_v4  ;;  %v85_v8 = vld [vmem:[#allocation5 + $0x20] sm:$0xff]  ;;  %v86_v9 = vld [vmem:[#allocation5 + $0x28] sm:$0xff]  ;;  %v177_v12 = vld [vmem:[#allocation7 + $0x10] sm:$0xff]  ;;  %s370_s29 = sshll.u32 %s749_s28, 4  ;;  %s371_s29 = int_to_ptr.vmem [resolvable:$true] %s370_s29 }
  0x4c   :  { %v175_v10 = vld [vmem:[#allocation7] sm:$0xff]  ;;  %v176_v11 = vld [vmem:[#allocation7 + $0x8] sm:$0xff]  ;;  %v178_v13 = vld [vmem:[#allocation7 + $0x18] sm:$0xff]  ;;  %v547_v14 = vpack.c.bf16 %v86_v9, %v85_v8  ;;  %s710_s30 = scalar_lea.vmem %s371_s29, 128  ;;  %p715_p5 = scmp.lt.s32.totalorder %s371_s29, %s371_s29 }
  0x4d   :  { %542 = vmatpush3.bf16.msra.mxu0 %v541_v5  ;;  %v565_v15 = vpack.c.bf16 %v176_v11, %v175_v10  ;;  %v87_v16 = vld [vmem:[#allocation5 + $0x30] sm:$0xff]  ;;  %v88_v17 = vld [vmem:[#allocation5 + $0x38] sm:$0xff]  ;;  %v568_v18 = vpack.c.bf16 %v178_v13, %v177_v12  ;;  %v179_v19 = vld [vmem:[#allocation7 + $0x20] sm:$0xff]  ;;  %p711_p4 = scmp.ne.s32.totalorder %s371_s29, %s710_s30  ;;  %p716_p6 = scmp.lt.s32.totalorder %s710_s30, %s710_s30 }
  0x4e   :  { %543 = vmatprep.subr.bf16.mxu0 %v746_v0  ;;  %v180_v20 = vld [vmem:[#allocation7 + $0x28] sm:$0xff]  ;;  %v550_v21 = vpack.c.bf16 %v88_v17, %v87_v16  ;;  %v89_v22 = vld [vmem:[#allocation5 + $0x40] sm:$0xff]  ;;  %v181_v25 = vld [vmem:[#allocation7 + $0x30] sm:$0xff] }
  0x4f   :  { %566 = vmatpush3.bf16.msra.mxu1 %v565_v15  ;;  %v90_v23 = vld [vmem:[#allocation5 + $0x48] sm:$0xff]  ;;  %v571_v24 = vpack.c.bf16 %v180_v20, %v179_v19  ;;  %v182_v26 = vld [vmem:[#allocation7 + $0x38] sm:$0xff]  ;;  %v91_v28 = vld [vmem:[#allocation5 + $0x50] sm:$0xff]  ;;  %p717_p7 = por %p716_p6, %p715_p5 }
  0x50   :  { %567 = vmatprep.subr.bf16.mxu1 %v746_v0  ;;  %v553_v27 = vpack.c.bf16 %v90_v23, %v89_v22  ;;  %v92_v29 = vld [vmem:[#allocation5 + $0x58] sm:$0xff]  ;;  %v574_v30 = vpack.c.bf16 %v182_v26, %v181_v25  ;;  %v183_v31 = vld [vmem:[#allocation7 + $0x40] sm:$0xff]  ;;  %v184_v32 = vld [vmem:[#allocation7 + $0x48] sm:$0xff] }
  0x51   :  { %545 = vmatpush3.bf16.msra.mxu0 %v544_v7  ;;  %v556_v33 = vpack.c.bf16 %v92_v29, %v91_v28  ;;  %v93_v34 = vld [vmem:[#allocation5 + $0x60] sm:$0xff]  ;;  %v94_v35 = vld [vmem:[#allocation5 + $0x68] sm:$0xff]  ;;  %v577_v36 = vpack.c.bf16 %v184_v32, %v183_v31  ;;  %v185_v37 = vld [vmem:[#allocation7 + $0x50] sm:$0xff]  ;;  %p718_p8 = pnand %p717_p7, %p711_p4 }
  0x52   :  { %546 = vmatprep.subr.bf16.mxu0 %v746_v0  ;;  %v186_v38 = vld [vmem:[#allocation7 + $0x58] sm:$0xff]  ;;  %v559_v39 = vpack.c.bf16 %v94_v35, %v93_v34  ;;  %v95_v40 = vld [vmem:[#allocation5 + $0x70] sm:$0xff]  ;;  %v187_v43 = vld [vmem:[#allocation7 + $0x60] sm:$0xff] }
  0x53   :  { %569 = vmatpush3.bf16.msra.mxu1 %v568_v18  ;;  %v96_v41 = vld [vmem:[#allocation5 + $0x78] sm:$0xff]  ;;  %v580_v42 = vpack.c.bf16 %v186_v38, %v185_v37  ;;  %v188_v44 = vld [vmem:[#allocation7 + $0x68] sm:$0xff]  ;;  %v189_v48 = vld [vmem:[#allocation7 + $0x70] sm:$0xff] }
  0x54   :  { %570 = vmatprep.subr.bf16.mxu1 %v746_v0  ;;  %v562_v45 = vpack.c.bf16 %v96_v41, %v95_v40  ;;  %v583_v46 = vpack.c.bf16 %v188_v44, %v187_v43  ;;  %v80_v47 = vld [vmem:[#allocation2] sm:$0xff]  ;;  %v269_v51 = vld [vmem:[#allocation8] sm:$0xff]  ;;  %v270_v52 = vld [vmem:[#allocation8 + $0x8] sm:$0xff] }
  0x55   :  { %548 = vmatpush3.bf16.msra.mxu0 %v547_v14  ;;  %v190_v49 = vld [vmem:[#allocation7 + $0x78] sm:$0xff]  ;;  %v271_v53 = vld [vmem:[#allocation8 + $0x10] sm:$0xff]  ;;  %v589_v54 = vpack.c.bf16 %v270_v52, %v269_v51  ;;  %v273_v57 = vld [vmem:[#allocation8 + $0x20] sm:$0xff] }
  0x56   :  { %549 = vmatprep.subr.bf16.mxu0 %v746_v0  ;;  %v586_v50 = vpack.c.bf16 %v190_v49, %v189_v48  ;;  %v272_v55 = vld [vmem:[#allocation8 + $0x18] sm:$0xff]  ;;  %v274_v58 = vld [vmem:[#allocation8 + $0x28] sm:$0xff]  ;;  %v275_v60 = vld [vmem:[#allocation8 + $0x30] sm:$0xff] }
  0x57   :  { %572 = vmatpush3.bf16.msra.mxu1 %v571_v24  ;;  %v592_v56 = vpack.c.bf16 %v272_v55, %v271_v53  ;;  %v595_v59 = vpack.c.bf16 %v274_v58, %v273_v57  ;;  %v276_v61 = vld [vmem:[#allocation8 + $0x38] sm:$0xff]  ;;  %v277_v63 = vld [vmem:[#allocation8 + $0x40] sm:$0xff]  ;;  %v279_v3 = vld [vmem:[#allocation8 + $0x50] sm:$0xff] }
  0x58   :  { %573 = vmatprep.subr.bf16.mxu1 %v746_v0  ;;  %v598_v62 = vpack.c.bf16 %v276_v61, %v275_v60  ;;  %v280_v4 = vld [vmem:[#allocation8 + $0x58] sm:$0xff]  ;;  %v281_v6 = vld [vmem:[#allocation8 + $0x60] sm:$0xff]  ;;  %v282_v7 = vld [vmem:[#allocation8 + $0x68] sm:$0xff] }
  0x59   :  { %551 = vmatpush3.bf16.msra.mxu0 %v550_v21  ;;  %v604_v5 = vpack.c.bf16 %v280_v4, %v279_v3  ;;  %v607_v8 = vpack.c.bf16 %v282_v7, %v281_v6  ;;  %v381_v9 = vld [vmem:[%s900_s2] ss:$0 sm:$0xff]  ;;  %v283_v14 = vld [vmem:[#allocation8 + $0x70] sm:$0xff] }
  0x5a   :  { %552 = vmatprep.subr.bf16.mxu0 %v746_v0  ;;  %v284_v15 = vld [vmem:[#allocation8 + $0x78] sm:$0xff] }
  0x5b   :  { %575 = vmatpush3.bf16.msra.mxu1 %v574_v30  ;;  %v610_v16 = vpack.c.bf16 %v284_v15, %v283_v14  ;;  %v382_v17 = vld [vmem:[%s902_s4] ss:$0 sm:$0xff] }
  0x5c   :  { %576 = vmatprep.subr.bf16.mxu1 %v746_v0  ;;  %v383_v21 = vld [vmem:[%s904_s6] ss:$0 sm:$0xff] }
  0x5d   :  { %554 = vmatpush3.bf16.msra.mxu0 %v553_v27 }
  0x5e   :  { %555 = vmatprep.subr.bf16.mxu0 %v746_v0 }
  0x5f   :  { %578 = vmatpush3.bf16.msra.mxu1 %v577_v36 }
  0x60   :  { %579 = vmatprep.subr.bf16.mxu1 %v746_v0 }
  0x61   :  { %557 = vmatpush3.bf16.msra.mxu0 %v556_v33 }
  0x62   :  { %558 = vmatprep.subr.bf16.mxu0 %v746_v0 }
  0x63   :  { %581 = vmatpush3.bf16.msra.mxu1 %v580_v42 }
  0x64   :  { %582 = vmatprep.subr.bf16.mxu1 %v746_v0 }
  0x65   :  { %560 = vmatpush3.bf16.msra.mxu0 %v559_v39 }
  0x66   :  { %561 = vmatprep.subr.bf16.mxu0 %v746_v0 }
  0x67   :  { %584 = vmatpush3.bf16.msra.mxu1 %v583_v46 }
  0x68   :  { %585 = vmatprep.subr.bf16.mxu1 %v746_v0 }
  0x69   :  { %563 = vmatpush3.bf16.msra.mxu0 %v562_v45 }
  0x6a   :  { %588 = vmatprep.subr.bf16.mxu0 %v746_v0 }
  0x6b   :  { %587 = vmatpush3.bf16.msra.mxu1 %v586_v50 }
  0x6c   :  { %468 = vmatmul.mubr.f32.vlgmr.msra.gmra.mrb[0].mxu0 %v80_v47 }
  0x6d   :  { %537 = vmatprep.mubr.msk.f32.mxu0 %vm747_vm0, %v748_v1  ;;  %590 = vmatpush3.bf16.msra.mxu0 %v589_v54  ;;  %v278_v1 = vld [vmem:[#allocation8 + $0x48] sm:$0xff] }
  0x6e   :  { %591 = vmatprep.subr.bf16.mxu0 %v746_v0  ;;  %v601_v2 = vpack.c.bf16 %v278_v1, %v277_v63 }
  0x71   :  { %593 = vmatpush3.bf16.msra.mxu0 %v592_v56 }
  0x72   :  { %594 = vmatprep.subr.bf16.mxu0 %v746_v0 }
  0x75   :  { %596 = vmatpush3.bf16.msra.mxu0 %v595_v59 }
  0x76   :  { %597 = vmatprep.subr.bf16.mxu0 %v746_v0 }
  0x79   :  { %599 = vmatpush3.bf16.msra.mxu0 %v598_v62 }
  0x7a   :  { %600 = vmatprep.subr.bf16.mxu0 %v746_v0 }
  0x7d   :  { %602 = vmatpush3.bf16.msra.mxu0 %v601_v2 }
  0x7e   :  { %603 = vmatprep.subr.bf16.mxu0 %v746_v0 }
  0x81   :  { %605 = vmatpush3.bf16.msra.mxu0 %v604_v5 }
  0x82   :  { %606 = vmatprep.subr.bf16.mxu0 %v746_v0 }
  0x85   :  { %608 = vmatpush3.bf16.msra.mxu0 %v607_v8 }
  0x86   :  { %609 = vmatprep.subr.bf16.mxu0 %v746_v0 }
  0x89   :  { %611 = vmatpush3.bf16.msra.mxu0 %v610_v16 }
 0x13f   :  { %v170_v10 = vpop.f32.mrb[0].mxu0 }
 0x140   :  { %v171_v11 = vadd.f32 %v381_v9, %v170_v10  ;;  %v469_v12 = vpop.f32.mrb[1].mxu0 }
 0x142   :  { %v174_v13 = vmax.f32 %v171_v11, 0.0 }
 0x144   :  { %503 = vmatmul.mubr.f32.vlgmr.msra.gmra.mrb[0].mxu1 %v174_v13 }
 0x217   :  { %v264_v18 = vpop.f32.mrb[0].mxu1 }
 0x218   :  { %v265_v19 = vadd.f32 %v382_v17, %v264_v18  ;;  %v504_v0 = vpop.f32.mrb[1].mxu1 }
 0x21a   :  { %v268_v20 = vmax.f32 %v265_v19, 0.0 }
 0x21c   :  { %538 = vmatmul.mubr.f32.vlgmr.msra.gmra.mrb[2].mxu0 %v268_v20 }
 0x2ef   :  { %v358_v22 = vpop.f32.mrb[2].mxu0 }
 0x2f0   :  { %v359_v23 = vadd.f32 %v383_v21, %v358_v22  ;;  %v539_v24 = vpop.f32.mrb[3].mxu0 }
 0x2f2   :  { %v362_v25 = vmax.f32 %v359_v23, 0.0 }
 0x2f4   :  { %363 = vst [vmem:[#allocation10] sm:$0xff] %v362_v25 }
 0x2f5   :  { %721 = shalt.err (!%p718_p8)
}
 0x2f6   :  { %s722_s9 = scalar_lea.hbm %s905_s7, 128 }
 0x2f7   :  { %p723_p9 = scmp.ne.s32.totalorder %s905_s7, %s722_s9  ;;  %p726_p10 = scmp.lt.u32.totalorder %s722_s9, %s905_s7 }
 0x2f9   :  { %p728_p11 = pnand %p726_p10, %p723_p9 }
 0x2fb   :  { %731 = shalt.err (!%p728_p11)
}
 0x2fc   :  { %373 = dma.vmem_to_hbm [thread:$0]  %s371_s29, 128, %s905_s7, [#allocation4]  }
 0x2fd   :  { %738 = dma.done.wait [#allocation4], 128  }
 0x2fe   :  { %739 = vsyncadd [#allocation4], 4294967168 }
 0x2ff   :  { %377 = vsyncpa [#allocation3], 1 }
 0x300   :  { %378 = vsyncpa [#allocation6], 1 }
 0x301   :  { %379 = vsyncpa [#allocation9], 1 }
 0x302   :  { %380 = vsyncpa [#allocation4], 1 }

// kernel: tpu_custom_call.1
= control target key start
LH: loop header
LB: loop body
LE: loop exit
PB: predicated region body
PF: predicated region fallthrough
CT: control target
= control target key end

     0   :  { %8 = vsyncpa [#allocation4], 0  ;;  %s396_s0 = inlined_call_operand.hbm [shape: f32[8,128], index: 0, kind: input, shape index: {}]   ;;  %s397_s1 = inlined_call_operand.hbm [shape: f32[128,128], index: 1, kind: input, shape index: {}]   ;;  %s398_s2 = inlined_call_operand.vmem [shape: f32[1,128], index: 2, kind: input, shape index: {}]   ;;  %s399_s3 = inlined_call_operand.hbm [shape: f32[8,128], index: 3, kind: output, shape index: {}]  }
   0x1   :  { %9 = vsyncpa [#allocation7], 0 }
   0x2   :  { %10 = vsyncpa [#allocation5], 0  ;;  %s322_s12 = smov [#allocation3]   ;;  %s323_s14 = smov [#allocation6]  }
   0x3   :  { %s17_s13 = sshll.u32 %s322_s12, 4  ;;  %s26_s15 = sshll.u32 %s323_s14, 4  ;;  %s18_s13 = int_to_ptr.vmem [resolvable:$true] %s17_s13  ;;  %s350_s15 = int_to_ptr.vmem [resolvable:$true] %s26_s15 }
   0x4   :  { %s250_s18 = scalar_lea.hbm %s396_s0, 128 }
   0x5   :  { %p251_p0 = scmp.ne.s32.totalorder %s396_s0, %s250_s18  ;;  %p254_p1 = scmp.lt.u32.totalorder %s250_s18, %s396_s0 }
   0x7   :  { %p256_p2 = pnand %p254_p1, %p251_p0 }
   0x9   :  { %259 = shalt.err (!%p256_p2)
}
   0xa   :  { %s260_s23 = scalar_lea.vmem %s18_s13, 128  ;;  %p265_p4 = scmp.lt.s32.totalorder %s18_s13, %s18_s13 }
   0xb   :  { %p261_p3 = scmp.ne.s32.totalorder %s18_s13, %s260_s23  ;;  %p266_p5 = scmp.lt.s32.totalorder %s260_s23, %s260_s23 }
   0xd   :  { %p267_p6 = por %p266_p5, %p265_p4 }
   0xf   :  { %p268_p7 = pnand %p267_p6, %p261_p3 }
  0x11   :  { %271 = shalt.err (!%p268_p7)
}
  0x12   :  { %20 = dma.hbm_to_vmem [thread:$0]  %s396_s0, 128, %s18_s13, [#allocation4]  }
  0x13   :  { %s272_s28 = scalar_lea.hbm %s397_s1, 2048 }
  0x14   :  { %p273_p8 = scmp.ne.s32.totalorder %s397_s1, %s272_s28  ;;  %p276_p9 = scmp.lt.u32.totalorder %s272_s28, %s397_s1 }
  0x16   :  { %p278_p10 = pnand %p276_p9, %p273_p8 }
  0x18   :  { %281 = shalt.err (!%p278_p10)
}
  0x19   :  { %s282_s6 = scalar_lea.vmem %s350_s15, 2048  ;;  %p287_p12 = scmp.lt.s32.totalorder %s350_s15, %s350_s15 }
  0x1a   :  { %p283_p11 = scmp.ne.s32.totalorder %s350_s15, %s282_s6  ;;  %p288_p13 = scmp.lt.s32.totalorder %s282_s6, %s282_s6 }
  0x1c   :  { %p289_p0 = por %p288_p13, %p287_p12 }
  0x1e   :  { %p290_p1 = pnand %p289_p0, %p283_p11 }
  0x20   :  { %293 = shalt.err (!%p290_p1)
}
  0x21   :  { %s324_s0 = smov 128   ;;  %s325_s7 = smov 8  }
  0x22   :  { %32 = dma.hbm_to_vmem [thread:$0]  %s397_s1, 2048, %s350_s15, [#allocation7], %s324_s0, %s324_s0, %s325_s7  }
  0x23   :  { %316 = dma.done.wait [#allocation4], 128  }
  0x24   :  { %317 = vsyncadd [#allocation4], 4294967168 }
  0x25   :  { %318 = dma.done.wait [#allocation7], 2048  }
  0x26   :  { %319 = vsyncadd [#allocation7], 4294965248  ;;  %v326_v0 = vmov 0.0|0.0   ;;  %vm327_vm0 = vmmov 0   ;;  %v328_v1 = vmov 0.0   ;;  %v55_v2 = vld [vmem:[#allocation6] sm:$0xff] }
  0x27   :  { %218 = vmatprep.subr.bf16.mxu0 %v326_v0  ;;  %215 = vmatprep.mubr.msk.f32.mxu0 %vm327_vm0, %v328_v1  ;;  %v56_v3 = vld [vmem:[#allocation6 + $0x8] sm:$0xff]  ;;  %v57_v4 = vld [vmem:[#allocation6 + $0x10] sm:$0xff]  ;;  %v58_v6 = vld [vmem:[#allocation6 + $0x18] sm:$0xff]  ;;  %s329_s11 = smov [#allocation8]  }
  0x28   :  { %v219_v5 = vpack.c.bf16 %v56_v3, %v55_v2  ;;  %v222_v7 = vpack.c.bf16 %v58_v6, %v57_v4  ;;  %v59_v8 = vld [vmem:[#allocation6 + $0x20] sm:$0xff]  ;;  %v60_v9 = vld [vmem:[#allocation6 + $0x28] sm:$0xff]  ;;  %v61_v11 = vld [vmem:[#allocation6 + $0x30] sm:$0xff]  ;;  %s155_s12 = sshll.u32 %s329_s11, 4  ;;  %s156_s12 = int_to_ptr.vmem [resolvable:$true] %s155_s12 }
  0x29   :  { %v225_v10 = vpack.c.bf16 %v60_v9, %v59_v8  ;;  %v62_v12 = vld [vmem:[#allocation6 + $0x38] sm:$0xff]  ;;  %v63_v14 = vld [vmem:[#allocation6 + $0x40] sm:$0xff]  ;;  %v64_v15 = vld [vmem:[#allocation6 + $0x48] sm:$0xff]  ;;  %s294_s13 = scalar_lea.vmem %s156_s12, 128  ;;  %p299_p3 = scmp.lt.s32.totalorder %s156_s12, %s156_s12 }
  0x2a   :  { %220 = vmatpush3.bf16.msra.mxu0 %v219_v5  ;;  %v228_v13 = vpack.c.bf16 %v62_v12, %v61_v11  ;;  %v231_v16 = vpack.c.bf16 %v64_v15, %v63_v14  ;;  %v65_v17 = vld [vmem:[#allocation6 + $0x50] sm:$0xff]  ;;  %v66_v18 = vld [vmem:[#allocation6 + $0x58] sm:$0xff]  ;;  %v67_v20 = vld [vmem:[#allocation6 + $0x60] sm:$0xff]  ;;  %p295_p2 = scmp.ne.s32.totalorder %s156_s12, %s294_s13  ;;  %p300_p4 = scmp.lt.s32.totalorder %s294_s13, %s294_s13 }
  0x2b   :  { %221 = vmatprep.subr.bf16.mxu0 %v326_v0  ;;  %v234_v19 = vpack.c.bf16 %v66_v18, %v65_v17  ;;  %v68_v21 = vld [vmem:[#allocation6 + $0x68] sm:$0xff]  ;;  %v69_v23 = vld [vmem:[#allocation6 + $0x70] sm:$0xff]  ;;  %v70_v24 = vld [vmem:[#allocation6 + $0x78] sm:$0xff] }
  0x2c   :  { %v237_v22 = vpack.c.bf16 %v68_v21, %v67_v20  ;;  %v240_v25 = vpack.c.bf16 %v70_v24, %v69_v23  ;;  %v54_v26 = vld [vmem:[#allocation3] sm:$0xff]  ;;  %p301_p5 = por %p300_p4, %p299_p3 }
  0x2d   :  { %v165_v27 = vld [vmem:[%s398_s2] ss:$0 sm:$0xff] }
  0x2e   :  { %223 = vmatpush3.bf16.msra.mxu0 %v222_v7  ;;  %p302_p6 = pnand %p301_p5, %p295_p2 }
  0x2f   :  { %224 = vmatprep.subr.bf16.mxu0 %v326_v0 }
  0x32   :  { %226 = vmatpush3.bf16.msra.mxu0 %v225_v10 }
  0x33   :  { %227 = vmatprep.subr.bf16.mxu0 %v326_v0 }
  0x36   :  { %229 = vmatpush3.bf16.msra.mxu0 %v228_v13 }
  0x37   :  { %230 = vmatprep.subr.bf16.mxu0 %v326_v0 }
  0x3a   :  { %232 = vmatpush3.bf16.msra.mxu0 %v231_v16 }
  0x3b   :  { %233 = vmatprep.subr.bf16.mxu0 %v326_v0 }
  0x3e   :  { %235 = vmatpush3.bf16.msra.mxu0 %v234_v19 }
  0x3f   :  { %236 = vmatprep.subr.bf16.mxu0 %v326_v0 }
  0x42   :  { %238 = vmatpush3.bf16.msra.mxu0 %v237_v22 }
  0x43   :  { %239 = vmatprep.subr.bf16.mxu0 %v326_v0 }
  0x46   :  { %241 = vmatpush3.bf16.msra.mxu0 %v240_v25 }
  0x49   :  { %216 = vmatmul.mubr.f32.vlgmr.msra.gmra.mrb[0].mxu0 %v54_v26 }
 0x11c   :  { %v137_v28 = vpop.f32.mrb[0].mxu0 }
 0x11d   :  { %v141_v29 = vadd.f32 %v165_v27, %v137_v28  ;;  %v217_v30 = vpop.f32.mrb[1].mxu0 }
 0x11f   :  { %v147_v31 = vmax.f32 %v141_v29, 0.0 }
 0x121   :  { %148 = vst [vmem:[#allocation8] sm:$0xff] %v147_v31 }
 0x122   :  { %305 = shalt.err (!%p302_p6)
}
 0x123   :  { %s306_s16 = scalar_lea.hbm %s399_s3, 128 }
 0x124   :  { %p307_p7 = scmp.ne.s32.totalorder %s399_s3, %s306_s16  ;;  %p310_p8 = scmp.lt.u32.totalorder %s306_s16, %s399_s3 }
 0x126   :  { %p312_p9 = pnand %p310_p8, %p307_p7 }
 0x128   :  { %315 = shalt.err (!%p312_p9)
}
 0x129   :  { %158 = dma.vmem_to_hbm [thread:$0]  %s156_s12, 128, %s399_s3, [#allocation5]  }
 0x12a   :  { %320 = dma.done.wait [#allocation5], 128  }
 0x12b   :  { %321 = vsyncadd [#allocation5], 4294967168 }
 0x12c   :  { %162 = vsyncpa [#allocation4], 1 }
 0x12d   :  { %163 = vsyncpa [#allocation7], 1 }
 0x12e   :  { %164 = vsyncpa [#allocation5], 1 }

</bundles_post_ra>
